<compile_context>
chip_gen: v7x
topology: tpu7x:2x2x1
jax: 0.10.0
libtpu: 0.0.40
codegen_flags: <defaults>
</compile_context>

<pallas_src>
import functools

import jax
import jax.numpy as jnp
from jax.experimental import pallas as pl
from jax.experimental.pallas import tpu as pltpu


def _yolo_kernel(x_ref, s_ref, o_ref):
    """One (TR, LC) tile of the YOLO head transform.

    s_ref is a single (1, LC) f32 row: anchor dimension on w/h lanes, 0
    elsewhere (anchor dims are strictly positive).  Each element needs either
    sigmoid(x) or exp(x)*anchor; both come from ONE EUP transcendental:
        em = exp(-x)
        sigmoid(x)        = 1 / (1 + em)
        exp(x) * anchor   = anchor / em
    i.e. one exp push + one divide per vreg instead of sigmoid + exp.
    """
    x = x_ref[...].astype(jnp.float32)           # compute in f32, any I/O dtype
    s = s_ref[...]                               # (1, LC)
    is_wh = s > 0.0                              # w/h lane predicate
    em = jnp.exp(-x)                             # single transcendental / element
    den = jnp.where(is_wh, em, 1.0 + em)         # (TR, LC)
    num = jnp.where(is_wh, s, 1.0)               # (1, LC), broadcast over rows
    o_ref[...] = (num / den).astype(o_ref.dtype)


def _tpu_hw():
    """(vmem_capacity_bytes, tensorcores) with conservative fallbacks."""
    vmem = 64 * 1024 * 1024      # v7x-sized fallback -> safe on every chip
    cores = 2                    # forced split costs only ~0.35us on 1-TC chips
    try:
        info = pltpu.get_tpu_info()
        vmem = int(getattr(info, "vmem_capacity_bytes", vmem))
        for name in ("num_cores", "core_count", "num_tensorcores"):
            v = getattr(info, name, None)
            if v:
                cores = int(v)
                break
    except Exception:
        pass
    return vmem, cores


def _divisors(n):
    out = []
    d = 1
    while d * d <= n:
        if n % d == 0:
            out.append(d)
            if d * d != n:
                out.append(n // d)
        d += 1
    return out


def _choose_layout(m, ac, itemsize, vmem_bytes, num_cores):
    """Pick (k, lc, r, tr): fold k rows into lanes (k | m), tile folded rows by tr."""
    max_lanes = 8192
    target_lanes = 1024
    # Sublane alignment is dtype-aware: bf16 packs 2 rows/sublane, int8/fp8 4.
    sub = {1: 32, 2: 16}.get(itemsize, 8)

    # Score every admissible fold factor instead of stopping at the first one:
    # prefer exact 128-multiples (unmasked vst), then width >= target, then the
    # lane density of the padded edge vreg, then raw width.
    cands = [k for k in _divisors(m) if k * ac <= max_lanes] or [1]

    def lane_score(k):
        lc = k * ac
        padded = -(-lc // 128) * 128
        return (lc % 128 == 0, min(lc, target_lanes), lc / padded, lc)

    k = max(cands, key=lane_score)
    lc = k * ac
    r = m // k

    # Block target: ~8 MiB on 128-MiB-VMEM chips (v5e/v6e), ~4 MiB on v7x.
    target_block_bytes = (8 << 20) if vmem_bytes >= (96 << 20) else (4 << 20)
    tr = max(1, target_block_bytes // (lc * itemsize))
    if tr >= r:
        tr = r
        # Whole tensor fits one block: split ~evenly across TensorCores so the
        # "parallel" grid axis gives balanced work; skip entirely on 1-TC chips.
        if num_cores > 1 and r > sub:
            per_core = -(-r // num_cores)
            tr_split = -(-per_core // sub) * sub
            if tr_split < r:
                tr = tr_split
    else:
        tr = max(sub, (tr // sub) * sub)
    return k, lc, r, tr


@functools.partial(jax.jit, static_argnames=("anchors",))
def yolo_layer(x, anchors):
    """x: (BS, GX, GY, A, 5 + n_classes); anchors: tuple of (w, h) tuples."""
    bs, gx, gy, a, c = x.shape
    assert a == len(anchors)
    assert c >= 5
    ac = a * c
    m = bs * gx * gy
    itemsize = jnp.dtype(x.dtype).itemsize

    vmem_bytes, num_cores = _tpu_hw()
    k, lc, r, tr = _choose_layout(m, ac, itemsize, vmem_bytes, num_cores)

    # Single (1, lc) constant row: anchor dim on w/h lanes, 0 elsewhere
    # (period ac, tiled k times to cover the folded lane axis).  Its block
    # index never changes across the grid, so Pallas DMAs it only once.
    anc = jnp.asarray(anchors, jnp.float32)                   # (A, 2)
    scale = jnp.zeros((a, c), jnp.float32).at[:, 2:4].set(anc)
    scale_row = jnp.tile(scale.reshape(1, ac), (1, k))        # (1, lc)

    x2d = x.reshape(r, lc)   # free reshape; bf16 stays bf16 on the wire

    # VMEM budget: double-buffered in + out blocks + constant row + 25% margin,
    # floored at 16 MiB.  Leaves ample headroom on v7x's 64 MiB / TensorCore.
    block_bytes = tr * lc * itemsize
    need = 2 * (block_bytes + block_bytes) + 2 * lc * 4
    vmem_limit = max(int(need * 1.25), 16 * 1024 * 1024)

    out2d = pl.pallas_call(
        _yolo_kernel,
        out_shape=jax.ShapeDtypeStruct((r, lc), x.dtype),
        grid_spec=pltpu.PrefetchScalarGridSpec(
            num_scalar_prefetch=0,
            grid=(pl.cdiv(r, tr),),
            in_specs=[
                pl.BlockSpec((tr, lc), lambda i: (i, 0)),
                pl.BlockSpec((1, lc), lambda i: (0, 0)),
            ],
            out_specs=pl.BlockSpec((tr, lc), lambda i: (i, 0)),
        ),
        compiler_params=pltpu.CompilerParams(
            dimension_semantics=("parallel",),
            vmem_limit_bytes=vmem_limit,
        ),
    )(x2d, scale_row)

    return out2d.reshape(bs, gx, gy, a, c)


def yolo_layer_ref(x, anchors):
    """Pure-JAX reference mirroring the PyTorch forward exactly."""
    anc = jnp.asarray(anchors, jnp.float32)
    xf = x.astype(jnp.float32)
    out_xy = jax.nn.sigmoid(xf[..., 0:2])
    out_wh = jnp.exp(xf[..., 2:4]) * anc
    out_obj = jax.nn.sigmoid(xf[..., 4:5])
    out_cls = jax.nn.sigmoid(xf[..., 5:])
    out = jnp.concatenate([out_xy, out_wh, out_obj, out_cls], axis=-1)
    return out.astype(x.dtype)


if __name__ == "__main__":
    key = jax.random.PRNGKey(0)

    # Case 1: docstring shape (2 anchors, 3 classes) -> lane-dense 512-wide fold.
    anchors1 = ((10.0, 13.0), (33.0, 23.0))
    x1 = jax.random.normal(key, (2, 4, 4, 2, 8), jnp.float32)
    out1 = jax.block_until_ready(yolo_layer(x1, anchors1))
    assert out1.shape == x1.shape
    assert jnp.allclose(out1, yolo_layer_ref(x1, anchors1), atol=1e-5, rtol=1e-5), \
        "mismatch vs reference (case 1)"

    # Case 2: YOLO-like head (3 anchors, 80 classes): multi-step grid, partial
    # last row block, odd lane width (no 128-multiple reachable copy-free).
    anchors2 = ((116.0, 90.0), (156.0, 198.0), (373.0, 326.0))
    key2, key3 = jax.random.split(key)
    x2 = jax.random.normal(key2, (3, 13, 13, 3, 85), jnp.float32)
    out2 = jax.block_until_ready(yolo_layer(x2, anchors2))
    assert out2.shape == x2.shape
    assert jnp.allclose(out2, yolo_layer_ref(x2, anchors2), atol=1e-5, rtol=1e-5), \
        "mismatch vs reference (case 2)"

    # Case 3: bf16 I/O (dtype-preserving wire format, 16-row sublane alignment).
    x3 = jax.random.normal(key3, (3, 13, 13, 3, 85), jnp.bfloat16)
    out3 = jax.block_until_ready(yolo_layer(x3, anchors2))
    assert out3.shape == x3.shape
    assert jnp.allclose(out3.astype(jnp.float32),
                        yolo_layer_ref(x3, anchors2).astype(jnp.float32),
                        atol=0.05, rtol=0.05), "mismatch vs reference (case 3, bf16)"

    print("KERNEL_OK")
</pallas_src>

<mosaic_0001>
module attributes {stable_mosaic.version = 11 : i64} {
  func.func @_yolo_kernel(%arg0: i32, %arg1: memref<1x512xf32, #tpu.memory_space<vmem>>, %arg2: memref<1x512xf32, #tpu.memory_space<vmem>>, %arg3: memref<1x512xf32, #tpu.memory_space<vmem>>) attributes {dimension_semantics = [#tpu.dimension_semantics<parallel>], iteration_bounds = array<i64: 1>, scalar_prefetch = 0 : i64, scratch_operands = 0 : i64, tpu.core_type = #tpu.core_type<tc>, window_params = [{transform_indices = @transform_0, window_bounds = array<i64: 1, 512>}, {pipeline_mode = #tpu.pipeline_mode<synchronous>, transform_indices = @transform_1, window_bounds = array<i64: 1, 512>}, {transform_indices = @transform_2, window_bounds = array<i64: 1, 512>}]} {
    %c0 = arith.constant 0 : index
    %c0_0 = arith.constant 0 : index
    %0 = vector.load %arg1[%c0, %c0_0] : memref<1x512xf32, #tpu.memory_space<vmem>>, vector<1x512xf32>
    %c0_1 = arith.constant 0 : index
    %c0_2 = arith.constant 0 : index
    %1 = vector.load %arg2[%c0_1, %c0_2] : memref<1x512xf32, #tpu.memory_space<vmem>>, vector<1x512xf32>
    %cst = arith.constant 0.000000e+00 : f32
    %2 = vector.broadcast %cst : f32 to vector<1x512xf32>
    %3 = arith.cmpf ogt, %1, %2 : vector<1x512xf32>
    %cst_3 = arith.constant 0.000000e+00 : f32
    %4 = vector.broadcast %cst_3 : f32 to vector<1x512xf32>
    %5 = arith.subf %4, %0 : vector<1x512xf32>
    %6 = math.exp %5 : vector<1x512xf32>
    %cst_4 = arith.constant 1.000000e+00 : f32
    %7 = vector.broadcast %cst_4 : f32 to vector<1x512xf32>
    %8 = arith.addf %7, %6 : vector<1x512xf32>
    %9 = arith.select %3, %6, %8 : vector<1x512xi1>, vector<1x512xf32>
    %cst_5 = arith.constant 1.000000e+00 : f32
    %10 = vector.broadcast %cst_5 : f32 to vector<1x512xf32>
    %11 = arith.select %3, %1, %10 : vector<1x512xi1>, vector<1x512xf32>
    %12 = arith.divf %11, %9 : vector<1x512xf32>
    %c0_6 = arith.constant 0 : index
    %c0_7 = arith.constant 0 : index
    %13 = vector.load %arg3[%c0_6, %c0_7] : memref<1x512xf32, #tpu.memory_space<vmem>>, vector<1x512xf32>
    tpu.vector_store %arg3[%c0_6, %c0_7], %12 {strides = array<i32>} : memref<1x512xf32, #tpu.memory_space<vmem>>, vector<1x512xf32>,
    return
  }
  func.func @transform_0(%arg0: i32) -> (i32, i32) {
    %c0_i32 = arith.constant 0 : i32
    %c0_i32_0 = arith.constant 0 : i32
    return %arg0, %c0_i32 : i32, i32
  }
  func.func @transform_1(%arg0: i32) -> (i32, i32) {
    %c0_i32 = arith.constant 0 : i32
    %c0_i32_0 = arith.constant 0 : i32
    %c0_i32_1 = arith.constant 0 : i32
    return %c0_i32, %c0_i32_0 : i32, i32
  }
  func.func @transform_2(%arg0: i32) -> (i32, i32) {
    %c0_i32 = arith.constant 0 : i32
    %c0_i32_0 = arith.constant 0 : i32
    return %arg0, %c0_i32 : i32, i32
  }
}

</mosaic_0001>

<bundles_post_ra>
// kernel: yolo_layer.1
= control target key start
LH: loop header
LB: loop body
LE: loop exit
PB: predicated region body
PF: predicated region fallthrough
CT: control target
= control target key end

     0   :  { %v22_v7 = vlaneseq  ;;  %s59_s0 = inlined_call_operand.vmem [shape: f32[1,512], index: 0, kind: input, shape index: {}]   ;;  %s60_s1 = inlined_call_operand.vmem [shape: f32[1,512], index: 1, kind: input, shape index: {}]   ;;  %s61_s2 = inlined_call_operand.vmem [shape: f32[1,512], index: 2, kind: output, shape index: {}]  }
   0x1   :  { %v11_v0 = vld [vmem:[%s59_s0] sm:$0xf] }
   0x2   :  { %v14_v1 = vsub.f32 0.0, %v11_v0  ;;  %v12_v3 = vld [vmem:[%s60_s1] sm:$0xf]  ;;  %vm24_vm1 = vcmp.lt.s32.totalorder %v22_v7, 512 }
   0x3   :  { %vm13_vm0 = vcmp.gt.f32.partialorder %v12_v3, 0.0 }
   0x4   :  { %v15_v2 = vmul.f32 1.442695, %v14_v1  ;;  %v19_v8 = vsel %vm13_vm0, %v12_v3, 1.0 }
   0x6   :  { %31 = vpow2.f32 %v15_v2 }
  0x10   :  { %v32_v4 = vpop.eup %31 }
  0x11   :  { %v17_v5 = vadd.f32 1.0, %v32_v4 }
  0x13   :  { %v18_v6 = vsel %vm13_vm0, %v32_v4, %v17_v5 }
  0x14   :  { %33 = vrcp.f32 %v18_v6 }
  0x1e   :  { %v34_v9 = vpop.eup %33 }
  0x1f   :  { %v21_v10 = vmul.f32 %v34_v9, %v19_v8 }
  0x21   :  { %26 = vst.msk [vmem:[%s61_s2] sm:$0xf] %vm24_vm1, %v21_v10 }

</bundles_post_ra>
